<compile_context>
chip_gen: v7x
topology: tpu7x:2x2x1
jax: 0.10.0
libtpu: 0.0.40
codegen_flags: <defaults>
</compile_context>

<pallas_src>
import math
from functools import partial

import jax
import jax.numpy as jnp
from jax import lax
from jax.experimental import pallas as pl
from jax.experimental.pallas import tpu as pltpu


def _tpu_defaults():
    """(block_n, vmem_limit_bytes) sized from the device's physical VMEM."""
    try:
        vmem = pltpu.get_tpu_info().vmem_capacity_bytes
    except Exception:
        vmem = 128 * 1024 * 1024
    if vmem >= (100 << 20):          # v5e / v6e: 128 MiB VMEM
        return 1024, 96 * 1024 * 1024
    return 512, 48 * 1024 * 1024     # v7x: 64 MiB VMEM per TC


_BLOCK_N, _VMEM_LIMIT = _tpu_defaults()


def _pick_tile_n(n, target):
    """Largest lane-dense (multiple-of-128) tile <= target that divides n, else n."""
    if n <= target or n % 128 != 0:
        return n
    tn = (target // 128) * 128
    while tn >= 128:
        if n % tn == 0:
            return tn
        tn -= 128
    return n


def _pick_chunk(ms, target=512):
    """Sequence-chunk size for attention: multiple of 8 that divides max_seq."""
    if ms <= target:
        return ms
    c = (min(target, ms) // 8) * 8
    while c >= 8:
        if ms % c == 0:
            return c
        c -= 8
    return ms


# --------------------------------------------------------------------------
# Fused RMSNorm + linear projection (bf16 weight streamed over N tiles)
# --------------------------------------------------------------------------

def _rms_linear_kernel(x_ref, nw_ref, w_ref, o_ref, *, eps, apply_norm):
    x = x_ref[...].astype(jnp.float32)                       # (M, K)
    if apply_norm:
        ms = jnp.mean(x * x, axis=-1, keepdims=True)
        x = x * lax.rsqrt(ms + eps) * nw_ref[...].astype(jnp.float32)
    acc = lax.dot_general(                                   # contract K, no transpose
        x.astype(w_ref.dtype), w_ref[...],
        dimension_numbers=(((1,), (1,)), ((), ())),
        preferred_element_type=jnp.float32)
    o_ref[...] = acc.astype(o_ref.dtype)


def rms_linear(x, norm_w, w, eps, *, apply_norm=True, out_dtype=None, block_n=None):
    # x: (M, K) f32;  norm_w: (1, K) f32;  w: (N, K) bf16  ->  (M, N)
    M, K = x.shape
    N, K2 = w.shape
    assert K == K2
    out_dtype = out_dtype or x.dtype
    block_n = block_n or _BLOCK_N
    pad = (-N) % 128
    if pad:
        # TODO(synk): pre-pad weights once at init for production; this is a fallback.
        w = jnp.pad(w, ((0, pad), (0, 0)))
    Np = N + pad
    tn = _pick_tile_n(Np, block_n)
    out = pl.pallas_call(
        partial(_rms_linear_kernel, eps=eps, apply_norm=apply_norm),
        out_shape=jax.ShapeDtypeStruct((M, Np), out_dtype),
        grid=(Np // tn,),
        in_specs=[
            pl.BlockSpec((M, K), lambda j: (0, 0)),
            pl.BlockSpec((1, K), lambda j: (0, 0)),
            pl.BlockSpec((tn, K), lambda j: (j, 0)),         # streamed weight tile
        ],
        out_specs=pl.BlockSpec((M, tn), lambda j: (0, j)),
        compiler_params=pltpu.CompilerParams(
            dimension_semantics=("parallel",),
            vmem_limit_bytes=_VMEM_LIMIT),
    )(x, norm_w, w)
    return out if pad == 0 else out[:, :N]


# --------------------------------------------------------------------------
# Fused SwiGLU activation + down projection (bf16 weight streamed over N tiles)
# --------------------------------------------------------------------------

def _swiglu_down_kernel(h_ref, w2_ref, o_ref):
    h = h_ref[...].astype(jnp.float32)                        # (M, 2H): [gate | up]
    H = h.shape[1] // 2
    g = h[:, :H]
    u = h[:, H:]
    act = (g * jax.nn.sigmoid(g)) * u                         # silu(gate) * up
    acc = lax.dot_general(
        act.astype(w2_ref.dtype), w2_ref[...],
        dimension_numbers=(((1,), (1,)), ((), ())),
        preferred_element_type=jnp.float32)
    o_ref[...] = acc.astype(o_ref.dtype)


def feed_forward(x, ffn_norm_w, w13, w2, eps):
    # x: (M, D);  w13: (2H, D) fused gate+up;  w2: (D, H)
    M, D = x.shape
    h13 = rms_linear(x, ffn_norm_w, w13, eps, apply_norm=True, out_dtype=jnp.bfloat16)
    N, H = w2.shape
    pad = (-N) % 128
    if pad:
        w2 = jnp.pad(w2, ((0, pad), (0, 0)))
    Np = N + pad
    tn = _pick_tile_n(Np, _BLOCK_N)
    out = pl.pallas_call(
        _swiglu_down_kernel,
        out_shape=jax.ShapeDtypeStruct((M, Np), jnp.float32),
        grid=(Np // tn,),
        in_specs=[
            pl.BlockSpec((M, 2 * H), lambda j: (0, 0)),
            pl.BlockSpec((tn, H), lambda j: (j, 0)),
        ],
        out_specs=pl.BlockSpec((M, tn), lambda j: (0, j)),
        compiler_params=pltpu.CompilerParams(
            dimension_semantics=("parallel",),
            vmem_limit_bytes=_VMEM_LIMIT),
    )(h13, w2)
    return out if pad == 0 else out[:, :N]


# --------------------------------------------------------------------------
# Fused rotary embedding + in-place KV-cache row write (input_output_aliases)
# Cache layout: (max_B * Hkv, max_S, Dh) bf16 -> per-kv-head contiguous slab.
# --------------------------------------------------------------------------

def _rope_cache_kernel(pos_ref, q_ref, k_ref, v_ref, cos_ref, sin_ref, perm_ref,
                       kc_hbm, vc_hbm, qo_ref, kc_out_ref, vc_out_ref):
    del pos_ref, kc_hbm, vc_hbm     # aliased caches stay in HBM untouched except new row
    cos = cos_ref[...].astype(jnp.float32)                    # (1, Dh): [c0,c0,c1,c1,..]
    sin = sin_ref[...].astype(jnp.float32)                    # (1, Dh): [-s0,s0,-s1,s1,..]
    P = perm_ref[...]                                         # (Dh, Dh) pair-swap perm

    def rope(x):                                              # x: (R, Dh) f32
        return x * cos + jnp.dot(x, P, preferred_element_type=jnp.float32) * sin

    q = q_ref[...].astype(jnp.float32)                        # (B*Hq, Dh)
    k = k_ref[...].astype(jnp.float32)                        # (B*Hkv, Dh)
    qo_ref[...] = rope(q).astype(qo_ref.dtype)
    kc_out_ref[:, 0, :] = rope(k).astype(kc_out_ref.dtype)    # write cache row start_pos
    vc_out_ref[:, 0, :] = v_ref[...].astype(vc_out_ref.dtype)


def rope_and_cache_update(xq, xk, xv, cos_row, sin_row, perm, cache_k, cache_v, pos):
    # xq: (B*Hq, Dh) bf16;  xk/xv: (B*Hkv, Dh) bf16;  caches: (MB*Hkv, MS, Dh) bf16
    BHq, Dh = xq.shape
    BHkv = xk.shape[0]
    grid_spec = pltpu.PrefetchScalarGridSpec(
        num_scalar_prefetch=1,
        grid=(1,),
        in_specs=[
            pl.BlockSpec((BHq, Dh), lambda i, pos: (0, 0)),
            pl.BlockSpec((BHkv, Dh), lambda i, pos: (0, 0)),
            pl.BlockSpec((BHkv, Dh), lambda i, pos: (0, 0)),
            pl.BlockSpec((1, Dh), lambda i, pos: (0, 0)),
            pl.BlockSpec((1, Dh), lambda i, pos: (0, 0)),
            pl.BlockSpec((Dh, Dh), lambda i, pos: (0, 0)),
            pl.BlockSpec(memory_space=pl.ANY),      # aliased K cache (HBM, no DMA in)
            pl.BlockSpec(memory_space=pl.ANY),      # aliased V cache (HBM, no DMA in)
        ],
        out_specs=[
            pl.BlockSpec((BHq, Dh), lambda i, pos: (0, 0)),
            pl.BlockSpec((BHkv, 1, Dh), lambda i, pos: (0, pos[0], 0)),
            pl.BlockSpec((BHkv, 1, Dh), lambda i, pos: (0, pos[0], 0)),
        ],
    )
    return pl.pallas_call(
        _rope_cache_kernel,
        grid_spec=grid_spec,
        out_shape=(jax.ShapeDtypeStruct((BHq, Dh), jnp.float32),
                   jax.ShapeDtypeStruct(cache_k.shape, cache_k.dtype),
                   jax.ShapeDtypeStruct(cache_v.shape, cache_v.dtype)),
        # operand order: pos(0), xq(1), xk(2), xv(3), cos(4), sin(5), perm(6),
        #                cache_k(7), cache_v(8)
        input_output_aliases={7: 1, 8: 2},
        compiler_params=pltpu.CompilerParams(
            dimension_semantics=("arbitrary",),
            vmem_limit_bytes=_VMEM_LIMIT),
    )(pos, xq, xk, xv, cos_row, sin_row, perm, cache_k, cache_v)


# --------------------------------------------------------------------------
# GQA single-token attention: grid (B*Hkv, seq_chunks), online softmax across chunks
# --------------------------------------------------------------------------

def _attn_kernel(pos_ref, q_ref, k_ref, v_ref, o_ref, m_sc, l_sc, acc_sc, *, scale, chunk):
    c = pl.program_id(1)

    @pl.when(c == 0)
    def _():
        m_sc[...] = jnp.full_like(m_sc, -jnp.inf)
        l_sc[...] = jnp.zeros_like(l_sc)
        acc_sc[...] = jnp.zeros_like(acc_sc)

    T = pos_ref[0] + 1                                        # valid cache length
    q = q_ref[0].astype(jnp.float32)                          # (n_rep, Dh)
    k = k_ref[0].astype(jnp.float32)                          # (chunk, Dh)
    v = v_ref[0].astype(jnp.float32)

    s = lax.dot_general(q, k, (((1,), (1,)), ((), ())),
                        preferred_element_type=jnp.float32) * scale   # (n_rep, chunk)
    span = c * chunk + lax.broadcasted_iota(jnp.int32, s.shape, 1)
    s = jnp.where(span < T, s, -1e30)                         # mask positions >= T

    m_new = jnp.maximum(m_sc[...], jnp.max(s, axis=-1, keepdims=True))
    alpha = jnp.exp(m_sc[...] - m_new)
    p = jnp.exp(s - m_new)
    l_sc[...] = alpha * l_sc[...] + jnp.sum(p, axis=-1, keepdims=True)
    acc_sc[...] = alpha * acc_sc[...] + jnp.dot(p, v, preferred_element_type=jnp.float32)
    m_sc[...] = m_new

    @pl.when(c == pl.num_programs(1) - 1)
    def _():
        o_ref[0] = (acc_sc[...] * pl.reciprocal(l_sc[...], approx=True)).astype(o_ref.dtype)


def gqa_attention(q_rot, cache_k, cache_v, pos, n_rep, scale):
    # q_rot: (B*Hq, Dh) f32;  caches: (MB*Hkv, MS, Dh) bf16  ->  (B*Hkv, n_rep, Dh) f32
    BHq, Dh = q_rot.shape
    BHkv = BHq // n_rep
    _, MS, _ = cache_k.shape
    chunk = _pick_chunk(MS)
    n_chunks = MS // chunk
    q = q_rot.reshape(BHkv, n_rep, Dh)

    # Chunks entirely past the valid length are clamped to the last valid chunk
    # (no redundant HBM DMA); their scores are fully masked in-kernel anyway.
    def kv_map(i, c, pos):
        return (i, jnp.minimum(c, pos[0] // chunk), 0)

    grid_spec = pltpu.PrefetchScalarGridSpec(
        num_scalar_prefetch=1,
        grid=(BHkv, n_chunks),
        in_specs=[
            pl.BlockSpec((1, n_rep, Dh), lambda i, c, pos: (i, 0, 0)),
            pl.BlockSpec((1, chunk, Dh), kv_map),
            pl.BlockSpec((1, chunk, Dh), kv_map),
        ],
        out_specs=pl.BlockSpec((1, n_rep, Dh), lambda i, c, pos: (i, 0, 0)),
        scratch_shapes=[pltpu.VMEM((n_rep, 1), jnp.float32),
                        pltpu.VMEM((n_rep, 1), jnp.float32),
                        pltpu.VMEM((n_rep, Dh), jnp.float32)],
    )
    return pl.pallas_call(
        partial(_attn_kernel, scale=scale, chunk=chunk),
        grid_spec=grid_spec,
        out_shape=jax.ShapeDtypeStruct((BHkv, n_rep, Dh), jnp.float32),
        compiler_params=pltpu.CompilerParams(
            dimension_semantics=("parallel", "arbitrary"),
            vmem_limit_bytes=_VMEM_LIMIT),
    )(pos, q, cache_k, cache_v)


# --------------------------------------------------------------------------
# Rotary tables (expanded for the interleaved-pair formulation) and glue
# --------------------------------------------------------------------------

def precompute_rope_tables(head_dim, max_seq_len, theta=10000.0):
    assert head_dim % 2 == 0
    idx = jnp.arange(0, head_dim, 2, dtype=jnp.float32)
    inv = 1.0 / (theta ** (idx / head_dim))
    m = jnp.arange(max_seq_len, dtype=jnp.float32)
    freqs = jnp.outer(m, inv)                                  # (T, Dh//2)
    cos = jnp.cos(freqs)
    sin = jnp.sin(freqs)
    cos_e = jnp.repeat(cos, 2, axis=-1)                        # [c0,c0,c1,c1,...]
    sin_s = jnp.stack([-sin, sin], axis=-1).reshape(max_seq_len, head_dim)
    r = jnp.arange(head_dim)
    perm = (r[None, :] == (r[:, None] ^ 1)).astype(jnp.float32)  # P[d, d^1] = 1
    return cos_e, sin_s, perm


def attention_forward(h, lp, cos_row, sin_row, perm, pos, cfg):
    B, S, D = h.shape                                          # S == 1 (decode)
    Hq, Hkv = cfg["n_heads"], cfg["n_kv_heads"]
    Dh = D // Hq
    n_rep = Hq // Hkv
    eps = cfg["norm_eps"]

    hf = h.reshape(B * S, D)
    # Fused: attention RMSNorm + concatenated Q/K/V projection (bf16 intermediate).
    qkv = rms_linear(hf, lp["attn_norm_w"], lp["wqkv"], eps,
                     apply_norm=True, out_dtype=jnp.bfloat16)
    nq, nkv = Hq * Dh, Hkv * Dh
    xq = qkv[:, :nq].reshape(B * Hq, Dh)
    xk = qkv[:, nq:nq + nkv].reshape(B * Hkv, Dh)
    xv = qkv[:, nq + nkv:].reshape(B * Hkv, Dh)

    # Fused rotary + in-place KV-cache row write (aliased caches).
    q_rot, new_k, new_v = rope_and_cache_update(
        xq, xk, xv, cos_row, sin_row, perm, lp["cache_k"], lp["cache_v"], pos)
    lp["cache_k"], lp["cache_v"] = new_k, new_v

    attn = gqa_attention(q_rot, new_k, new_v, pos, n_rep, 1.0 / math.sqrt(Dh))
    attn_flat = attn.reshape(B, Hq * Dh)

    # Output projection (norm weight ignored when apply_norm=False).
    out = rms_linear(attn_flat, lp["attn_norm_w"], lp["wo"], eps,
                     apply_norm=False, out_dtype=jnp.float32)
    return out.reshape(B, S, D)


def encoder_block(h, lp, cos_row, sin_row, perm, pos, cfg):
    B, S, D = h.shape
    h = h + attention_forward(h, lp, cos_row, sin_row, perm, pos, cfg)
    ff = feed_forward(h.reshape(B * S, D), lp["ffn_norm_w"], lp["w13"], lp["w2"],
                      cfg["norm_eps"])
    return h + ff.reshape(B, S, D)


def transformer_forward(params, tokens, start_pos, cfg):
    B, S = tokens.shape
    assert S == 1, "Only one token is allowed to be passed at a time"
    D = cfg["dim"]

    # TODO(synk): embedding gather is a tiny per-token HBM gather; kept in plain JAX.
    h = params["tok_emb"][tokens].astype(jnp.float32)          # (B, 1, D)
    cos_row = params["rope_cos"][start_pos:start_pos + 1]      # (1, Dh)
    sin_row = params["rope_sin"][start_pos:start_pos + 1]
    perm = params["rope_perm"]
    pos = jnp.asarray([start_pos], jnp.int32)

    for lp in params["layers"]:
        h = encoder_block(h, lp, cos_row, sin_row, perm, pos, cfg)

    # Fused: final RMSNorm + LM head (f32 logits, tiled over vocab).
    logits = rms_linear(h.reshape(B * S, D), params["norm_w"], params["output_w"],
                        cfg["norm_eps"], apply_norm=True, out_dtype=jnp.float32)
    return logits.reshape(B, S, cfg["vocab_size"])


# --------------------------------------------------------------------------
# Deterministic parameter construction
# --------------------------------------------------------------------------

def init_params(key, cfg):
    D = cfg["dim"]
    Hq, Hkv = cfg["n_heads"], cfg["n_kv_heads"]
    Dh = D // Hq
    V = cfg["vocab_size"]
    # FFN hidden dim exactly as the PyTorch FeedForward.__init__ computes it.
    hidden = 4 * D
    hidden = int(2 * hidden / 3)
    if cfg.get("ffn_dim_multiplier") is not None:
        hidden = int(cfg["ffn_dim_multiplier"] * hidden)
    mo = cfg["multiple_of"]
    hidden = mo * ((hidden + mo - 1) // mo)

    wdt = jnp.bfloat16   # weights stored/streamed in bf16, f32 MXU accumulation

    def nrm(k, shape, scale=0.02):
        return (scale * jax.random.normal(k, shape, dtype=jnp.float32)).astype(wdt)

    keys = jax.random.split(key, 2 + 4 * cfg["n_layers"])
    ki = iter(keys)

    params = {
        "tok_emb": 0.02 * jax.random.normal(next(ki), (V, D), dtype=jnp.float32),
        "norm_w": jnp.ones((1, D), jnp.float32),
        "output_w": nrm(next(ki), (V, D)),
        "layers": [],
    }
    cos_e, sin_s, perm = precompute_rope_tables(Dh, cfg["max_seq_len"] * 2)
    params["rope_cos"], params["rope_sin"], params["rope_perm"] = cos_e, sin_s, perm

    for _ in range(cfg["n_layers"]):
        lp = {
            # Fused QKV weight: rows = [wq (Hq*Dh) | wk (Hkv*Dh) | wv (Hkv*Dh)].
            "wqkv": nrm(next(ki), ((Hq + 2 * Hkv) * Dh, D)),
            "wo": nrm(next(ki), (D, Hq * Dh)),
            # Fused gate+up weight: rows = [w1 (hidden) | w3 (hidden)].
            "w13": nrm(next(ki), (2 * hidden, D)),
            "w2": nrm(next(ki), (D, hidden)),
            "attn_norm_w": jnp.ones((1, D), jnp.float32),
            "ffn_norm_w": jnp.ones((1, D), jnp.float32),
            # bf16 per-kv-head cache: (max_B * Hkv, max_S, Dh)
            "cache_k": jnp.zeros((cfg["max_batch_size"] * Hkv, cfg["max_seq_len"], Dh),
                                 jnp.bfloat16),
            "cache_v": jnp.zeros((cfg["max_batch_size"] * Hkv, cfg["max_seq_len"], Dh),
                                 jnp.bfloat16),
        }
        params["layers"].append(lp)
    return params


# --------------------------------------------------------------------------
# Main
# --------------------------------------------------------------------------

if __name__ == "__main__":
    cfg = dict(
        dim=128,
        n_layers=2,
        n_heads=4,
        n_kv_heads=2,
        vocab_size=512,
        multiple_of=128,
        ffn_dim_multiplier=None,
        norm_eps=1e-6,
        max_batch_size=4,
        max_seq_len=16,
    )

    key = jax.random.PRNGKey(0)
    pkey, tkey = jax.random.split(key)
    params = init_params(pkey, cfg)

    batch = 2
    tokens = jax.random.randint(tkey, (batch, 1), 0, cfg["vocab_size"], dtype=jnp.int32)
    start_pos = 3  # positions [0, start_pos) attend over the zero-initialized cache,
                   # matching the PyTorch module's fresh (zeros) cache semantics.

    logits = transformer_forward(params, tokens, start_pos, cfg)
    logits = jax.block_until_ready(logits)

    assert logits.shape == (batch, 1, cfg["vocab_size"])
    assert logits.dtype == jnp.float32
    assert bool(jnp.all(jnp.isfinite(logits)))
    print("KERNEL_OK")
</pallas_src>

<mosaic_0001>
module attributes {stable_mosaic.version = 11 : i64} {
  func.func @_rms_linear_kernel(%arg0: i32, %arg1: memref<2x128xf32, #tpu.memory_space<vmem>>, %arg2: memref<1x128xf32, #tpu.memory_space<vmem>>, %arg3: memref<256x128xbf16, #tpu.memory_space<vmem>>, %arg4: memref<2x256xbf16, #tpu.memory_space<vmem>>) attributes {dimension_semantics = [#tpu.dimension_semantics<parallel>], iteration_bounds = array<i64: 1>, scalar_prefetch = 0 : i64, scratch_operands = 0 : i64, tpu.core_type = #tpu.core_type<tc>, window_params = [{pipeline_mode = #tpu.pipeline_mode<synchronous>, transform_indices = @transform_0, window_bounds = array<i64: 2, 128>}, {pipeline_mode = #tpu.pipeline_mode<synchronous>, transform_indices = @transform_1, window_bounds = array<i64: 1, 128>}, {transform_indices = @transform_2, window_bounds = array<i64: 256, 128>}, {transform_indices = @transform_3, window_bounds = array<i64: 2, 256>}]} {
    %c0 = arith.constant 0 : index
    %c0_0 = arith.constant 0 : index
    %0 = vector.load %arg1[%c0, %c0_0] : memref<2x128xf32, #tpu.memory_space<vmem>>, vector<2x128xf32>
    %1 = arith.mulf %0, %0 : vector<2x128xf32>
    %cst = arith.constant dense<0.000000e+00> : vector<2xf32>
    %2 = vector.multi_reduction <add>, %1, %cst [1] : vector<2x128xf32> to vector<2xf32>
    %3 = vector.shape_cast %2 : vector<2xf32> to vector<2x1xf32>
    %cst_1 = arith.constant 1.280000e+02 : f32
    %4 = vector.broadcast %cst_1 : f32 to vector<2x1xf32>
    %5 = arith.divf %3, %4 : vector<2x1xf32>
    %cst_2 = arith.constant 9.99999997E-7 : f32
    %6 = vector.broadcast %cst_2 : f32 to vector<2x1xf32>
    %7 = arith.addf %5, %6 : vector<2x1xf32>
    %8 = math.rsqrt %7 : vector<2x1xf32>
    %9 = vector.broadcast %8 : vector<2x1xf32> to vector<2x128xf32>
    %10 = arith.mulf %0, %9 : vector<2x128xf32>
    %c0_3 = arith.constant 0 : index
    %c0_4 = arith.constant 0 : index
    %11 = vector.load %arg2[%c0_3, %c0_4] : memref<1x128xf32, #tpu.memory_space<vmem>>, vector<1x128xf32>
    %12 = vector.broadcast %11 : vector<1x128xf32> to vector<2x128xf32>
    %13 = arith.mulf %10, %12 : vector<2x128xf32>
    %14 = arith.truncf %13 : vector<2x128xf32> to vector<2x128xbf16>
    %c0_5 = arith.constant 0 : index
    %c0_6 = arith.constant 0 : index
    %15 = vector.load %arg3[%c0_5, %c0_6] : memref<256x128xbf16, #tpu.memory_space<vmem>>, vector<256x128xbf16>
    %cst_7 = arith.constant dense<0.000000e+00> : vector<2x256xf32>
    %16 = tpu.matmul %14, %15, %cst_7 {dimension_numbers = #tpu.dot_dimension_numbers<[1], [1], [0], [0], [0, 0, 1, 0], [], []>} : vector<2x128xbf16>, vector<256x128xbf16>, vector<2x256xf32> -> vector<2x256xf32>
    %17 = arith.truncf %16 : vector<2x256xf32> to vector<2x256xbf16>
    %c0_8 = arith.constant 0 : index
    %c0_9 = arith.constant 0 : index
    %18 = vector.load %arg4[%c0_8, %c0_9] : memref<2x256xbf16, #tpu.memory_space<vmem>>, vector<2x256xbf16>
    tpu.vector_store %arg4[%c0_8, %c0_9], %17 {strides = array<i32>} : memref<2x256xbf16, #tpu.memory_space<vmem>>, vector<2x256xbf16>,
    return
  }
  func.func @transform_0(%arg0: i32) -> (i32, i32) {
    %c0_i32 = arith.constant 0 : i32
    %c0_i32_0 = arith.constant 0 : i32
    %c0_i32_1 = arith.constant 0 : i32
    return %c0_i32, %c0_i32_0 : i32, i32
  }
  func.func @transform_1(%arg0: i32) -> (i32, i32) {
    %c0_i32 = arith.constant 0 : i32
    %c0_i32_0 = arith.constant 0 : i32
    %c0_i32_1 = arith.constant 0 : i32
    return %c0_i32, %c0_i32_0 : i32, i32
  }
  func.func @transform_2(%arg0: i32) -> (i32, i32) {
    %c0_i32 = arith.constant 0 : i32
    %c0_i32_0 = arith.constant 0 : i32
    return %arg0, %c0_i32 : i32, i32
  }
  func.func @transform_3(%arg0: i32) -> (i32, i32) {
    %c0_i32 = arith.constant 0 : i32
    %c0_i32_0 = arith.constant 0 : i32
    return %c0_i32, %arg0 : i32, i32
  }
}

</mosaic_0001>

<bundles_post_ra>
// kernel: tpu_custom_call.1
= control target key start
LH: loop header
LB: loop body
LE: loop exit
PB: predicated region body
PF: predicated region fallthrough
CT: control target
= control target key end

     0   :  { %8 = vsyncpa [#allocation3], 0  ;;  %s510_s0 = inlined_call_operand.hbm [shape: f32[2,128], index: 0, kind: input, shape index: {}]   ;;  %s511_s1 = inlined_call_operand.hbm [shape: f32[1,128], index: 1, kind: input, shape index: {}]   ;;  %s512_s2 = inlined_call_operand.hbm [shape: bf16[256,128], index: 2, kind: input, shape index: {}]   ;;  %s513_s3 = inlined_call_operand.hbm [shape: bf16[2,256], index: 3, kind: output, shape index: {}]  }
   0x1   :  { %9 = vsyncpa [#allocation6], 0 }
   0x2   :  { %10 = vsyncpa [#allocation4], 0  ;;  %s435_s12 = smov [#allocation5]   ;;  %s436_s14 = smov [#allocation2]  }
   0x3   :  { %s27_s13 = sshll.u32 %s435_s12, 4  ;;  %s17_s15 = sshll.u32 %s436_s14, 4  ;;  %s28_s13 = int_to_ptr.vmem [resolvable:$true] %s27_s13  ;;  %s18_s15 = int_to_ptr.vmem [resolvable:$true] %s17_s15 }
   0x4   :  { %s341_s18 = scalar_lea.hbm %s511_s1, 16 }
   0x5   :  { %p342_p0 = scmp.ne.s32.totalorder %s511_s1, %s341_s18  ;;  %p345_p1 = scmp.lt.u32.totalorder %s341_s18, %s511_s1 }
   0x7   :  { %p347_p2 = pnand %p345_p1, %p342_p0 }
   0x9   :  { %350 = shalt.err (!%p347_p2)
}
   0xa   :  { %s351_s23 = scalar_lea.vmem %s28_s13, 16  ;;  %s355_s24 = scalar_lea.vmem %s28_s13, 32 }
   0xb   :  { %p352_p3 = scmp.ne.s32.totalorder %s28_s13, %s351_s23  ;;  %p356_p4 = scmp.lt.s32.totalorder %s28_s13, %s28_s13 }
   0xc   :  { %p357_p5 = scmp.lt.s32.totalorder %s355_s24, %s351_s23 }
   0xe   :  { %p358_p6 = por %p357_p5, %p356_p4 }
  0x10   :  { %p359_p7 = pnand %p358_p6, %p352_p3 }
  0x12   :  { %362 = shalt.err (!%p359_p7)
}
  0x13   :  { %30 = dma.hbm_to_vmem [thread:$0]  %s511_s1, 16, %s28_s13, [#allocation6]  }
  0x14   :  { %s363_s29 = scalar_lea.hbm %s510_s0, 32 }
  0x15   :  { %p364_p8 = scmp.ne.s32.totalorder %s510_s0, %s363_s29  ;;  %p367_p9 = scmp.lt.u32.totalorder %s363_s29, %s510_s0 }
  0x17   :  { %p369_p10 = pnand %p367_p9, %p364_p8 }
  0x19   :  { %372 = shalt.err (!%p369_p10)
}
  0x1a   :  { %s373_s7 = scalar_lea.vmem %s18_s15, 32  ;;  %p378_p12 = scmp.lt.s32.totalorder %s18_s15, %s18_s15 }
  0x1b   :  { %p374_p11 = scmp.ne.s32.totalorder %s18_s15, %s373_s7  ;;  %p379_p13 = scmp.lt.s32.totalorder %s373_s7, %s373_s7 }
  0x1d   :  { %p380_p0 = por %p379_p13, %p378_p12 }
  0x1f   :  { %p381_p1 = pnand %p380_p0, %p374_p11 }
  0x21   :  { %384 = shalt.err (!%p381_p1)
}
  0x22   :  { %20 = dma.hbm_to_vmem [thread:$0]  %s510_s0, 32, %s18_s15, [#allocation3]  }
  0x23   :  { %s437_s9 = smov [#allocation7]   ;;  %s385_s13 = scalar_lea.hbm %s512_s2, 2048 }
  0x24   :  { %s36_s10 = sshll.u32 %s437_s9, 4  ;;  %p386_p2 = scmp.ne.s32.totalorder %s512_s2, %s385_s13  ;;  %s37_s10 = int_to_ptr.vmem [resolvable:$true] %s36_s10 }
  0x25   :  { %p389_p3 = scmp.lt.u32.totalorder %s385_s13, %s512_s2 }
  0x27   :  { %p391_p4 = pnand %p389_p3, %p386_p2 }
  0x29   :  { %394 = shalt.err (!%p391_p4)
}
  0x2a   :  { %s395_s19 = scalar_lea.vmem %s37_s10, 2048  ;;  %p400_p6 = scmp.lt.s32.totalorder %s37_s10, %s37_s10 }
  0x2b   :  { %p396_p5 = scmp.ne.s32.totalorder %s37_s10, %s395_s19  ;;  %p401_p7 = scmp.lt.s32.totalorder %s395_s19, %s395_s19 }
  0x2d   :  { %p402_p8 = por %p401_p7, %p400_p6 }
  0x2f   :  { %p403_p9 = pnand %p402_p8, %p396_p5 }
  0x31   :  { %406 = shalt.err (!%p403_p9)
}
  0x32   :  { %s438_s0 = smov 64   ;;  %s439_s15 = smov 4  }
  0x33   :  { %42 = dma.hbm_to_vmem [thread:$0]  %s512_s2, 2048, %s37_s10, [#allocation6], %s438_s0, %s438_s0, %s439_s15  }
  0x34   :  { %429 = dma.done.wait [#allocation3], 32  }
  0x35   :  { %430 = vsyncadd [#allocation3], 4294967264 }
  0x36   :  { %431 = dma.done.wait [#allocation6], 2064  }
  0x37   :  { %432 = vsyncadd [#allocation6], 4294965232  ;;  %vm55_vm0 = vcmask 1041408   ;;  %v53_v0 = vld [vmem:[#allocation2] sm:$0x3]  ;;  %v323_v2 = vld [vmem:[#allocation7 + $0x40] sm:$0xff]   ;;  %v250_v29 = vlaneseq }
  0x38   :  { %v54_v1 = vmul.f32 %v53_v0, %v53_v0  ;;  %v324_v3 = vld [vmem:[#allocation7] sm:$0xff]   ;;  %298 = vmatprep.subr.bf16.mxu0 %v323_v2  ;;  %v325_v5 = vld [vmem:[#allocation7 + $0x48] sm:$0xff]   ;;  %v327_v7 = vld [vmem:[#allocation7 + $0x50] sm:$0xff]   ;;  %v440_v27 = vmov 1966171168   ;;  %s441_s2 = smov [#allocation8]  }
  0x39   :  { %299 = vmatpush3.bf16.xpose.msra.mxu0 %v324_v3  ;;  %v326_v6 = vld [vmem:[#allocation7 + $0x8] sm:$0xff]   ;;  %v328_v8 = vld [vmem:[#allocation7 + $0x10] sm:$0xff]   ;;  %v329_v9 = vld [vmem:[#allocation7 + $0x58] sm:$0xff]   ;;  %v248_v28 = vunpack.c.l.s4 %v440_v27  ;;  %v251_v31 = vshrl.u32 %v250_v29, 7  ;;  %s269_s22 = sshll.u32 %s441_s2, 4  ;;  %s270_s22 = int_to_ptr.vmem [resolvable:$true] %s269_s22 }
  0x3a   :  { %v56_v4 = vsel %vm55_vm0, %v54_v1, 0.0  ;;  %300 = vmatprep.subr.bf16.mxu0 %v325_v5  ;;  %v330_v10 = vld [vmem:[#allocation7 + $0x18] sm:$0xff]   ;;  %v331_v11 = vld [vmem:[#allocation7 + $0x60] sm:$0xff]   ;;  %v333_v13 = vld [vmem:[#allocation7 + $0x68] sm:$0xff]   ;;  %s407_s23 = scalar_lea.vmem %s270_s22, 32  ;;  %p412_p11 = scmp.lt.s32.totalorder %s270_s22, %s270_s22 }
  0x3b   :  { %57 = vadd.xlane.f32.xlu0 %v56_v4  ;;  %v332_v12 = vld [vmem:[#allocation7 + $0x20] sm:$0xff]   ;;  %v334_v14 = vld [vmem:[#allocation7 + $0x28] sm:$0xff]   ;;  %v335_v15 = vld [vmem:[#allocation7 + $0x70] sm:$0xff]   ;;  %v249_v30 = vunpack.c.0.s8 %v248_v28  ;;  %p408_p10 = scmp.ne.s32.totalorder %s270_s22, %s407_s23  ;;  %p413_p12 = scmp.lt.s32.totalorder %s407_s23, %s407_s23 }
  0x3c   :  { %v336_v16 = vld [vmem:[#allocation7 + $0x30] sm:$0xff]   ;;  %v337_v17 = vld [vmem:[#allocation7 + $0x78] sm:$0xff]  }
  0x3d   :  { %v338_v18 = vld [vmem:[#allocation7 + $0x38] sm:$0xff]   ;;  %v252_v33 = vsub.s32 %v249_v30, %v251_v31  ;;  %p414_p13 = por %p413_p12, %p412_p11 }
  0x3e   :  { %v279_v23 = vld [vmem:[#allocation5] ss:$0 sm:$0xff] }
  0x3f   :  { %p415_p0 = pnand %p414_p13, %p408_p10 }
  0x41   :  { %301 = vmatpush3.bf16.xpose.msra.mxu0 %v326_v6 }
  0x42   :  { %302 = vmatprep.subr.bf16.mxu0 %v327_v7 }
  0x49   :  { %303 = vmatpush3.bf16.xpose.msra.mxu0 %v328_v8 }
  0x4a   :  { %304 = vmatprep.subr.bf16.mxu0 %v329_v9 }
  0x51   :  { %305 = vmatpush3.bf16.xpose.msra.mxu0 %v330_v10 }
  0x52   :  { %306 = vmatprep.subr.bf16.mxu0 %v331_v11 }
  0x59   :  { %307 = vmatpush3.bf16.xpose.msra.mxu0 %v332_v12 }
  0x5a   :  { %308 = vmatprep.subr.bf16.mxu0 %v333_v13 }
  0x61   :  { %309 = vmatpush3.bf16.xpose.msra.mxu0 %v334_v14 }
  0x62   :  { %310 = vmatprep.subr.bf16.mxu0 %v335_v15 }
  0x69   :  { %311 = vmatpush3.bf16.xpose.msra.mxu0 %v336_v16 }
  0x6a   :  { %312 = vmatprep.subr.bf16.mxu0 %v337_v17 }
  0x71   :  { %313 = vmatpush3.bf16.xpose.msra.mxu0 %v338_v18 }
  0xc8   :  { %v58_v19 = vpop.xlane.xlu0 %57 }
  0xc9   :  { %v60_v20 = vmul.f32 0.0078125, %v58_v19 }
  0xcb   :  { %v61_v21 = vadd.f32 1e-06, %v60_v20 }
  0xcd   :  { %339 = vrsqrt.f32 %v61_v21 }
  0xd7   :  { %v340_v22 = vpop.eup %339 }
  0xd8   :  { %v63_v24 = vmul.f32 %v340_v22, %v53_v0 }
  0xda   :  { %v71_v25 = vmul.f32 %v279_v23, %v63_v24 }
  0xdc   :  { %v72_v26 = vpack.c.bf16 %v71_v25, %v71_v25 }
  0xde   :  { %314 = vmatprep.mubr.bf16.mxu0 %v72_v26 }
  0xdf   :  { %315 = vmatmul.mubr.bf16.vlgmr.msra.gmra.mrb[0].mxu0 %v72_v26 }
 0x1b2   :  { %v235_v32 = vpop.f32.mrb[0].mxu0 }
 0x1b3   :  { %v237_v34 = vpop.f32.mrb[1].mxu0 }
 0x1b4   :  { %v296_v35 = vpack.c.bf16 %v237_v34, %v235_v32  ;;  %v239_v36 = vpop.f32.mrb[2].mxu0 }
 0x1b5   :  { %v240_v37 = vpop.f32.mrb[3].mxu0 }
 0x1b6   :  { %v253_v38 = vrot.slane %v296_v35, %v252_v33 }
 0x1b8   :  { %297 = vst.sshfl [vmem:[#allocation8] sm:$0x5 pattern:$0x73625140] %v253_v38 }
 0x1b9   :  { %418 = shalt.err (!%p415_p0)
}
 0x1ba   :  { %s419_s26 = scalar_lea.hbm %s513_s3, 32 }
 0x1bb   :  { %p420_p1 = scmp.ne.s32.totalorder %s513_s3, %s419_s26  ;;  %p423_p2 = scmp.lt.u32.totalorder %s419_s26, %s513_s3 }
 0x1bd   :  { %p425_p3 = pnand %p423_p2, %p420_p1 }
 0x1bf   :  { %428 = shalt.err (!%p425_p3)
}
 0x1c0   :  { %272 = dma.vmem_to_hbm [thread:$0]  %s270_s22, 32, %s513_s3, [#allocation4]  }
 0x1c1   :  { %433 = dma.done.wait [#allocation4], 32  }
 0x1c2   :  { %434 = vsyncadd [#allocation4], 4294967264 }
 0x1c3   :  { %276 = vsyncpa [#allocation3], 1 }
 0x1c4   :  { %277 = vsyncpa [#allocation6], 1 }
 0x1c5   :  { %278 = vsyncpa [#allocation4], 1 }

</bundles_post_ra>
